<compile_context>
chip_gen: v6e
topology: v6e:2x2x1
jax: 0.10.0
libtpu: 0.0.40
codegen_flags: <defaults>
</compile_context>

<pallas_src>
import functools

import jax
import jax.numpy as jnp
from jax.experimental import pallas as pl
from jax.experimental.pallas import tpu as pltpu


def _round_up(x, m):
    return ((x + m - 1) // m) * m


def _vmem_capacity_bytes():
    """Per-core VMEM capacity; falls back to the smallest current part (v7x: 64 MiB)."""
    try:
        cap = getattr(pltpu.get_tpu_info(), "vmem_capacity_bytes", None)
        if cap:
            return int(cap)
    except Exception:
        pass
    return 64 * 2**20


def _resident_spec(block_shape):
    """BlockSpec for a grid-invariant operand (constant index_map).

    Requests single buffering: the block never changes across grid steps, so
    double-buffering it only wastes VMEM. Falls back to the default pipeline
    mode on JAX versions without BlockSpec.pipeline_mode / pl.Buffered.
    """
    index_map = lambda i: (0,) * len(block_shape)
    buffered = getattr(pl, "Buffered", None)
    if buffered is not None:
        try:
            return pl.BlockSpec(block_shape, index_map, pipeline_mode=buffered(1))
        except Exception:
            pass
    return pl.BlockSpec(block_shape, index_map)


def mlp_kernel(x_ref, w1_ref, b1_ref, w2_ref, b2_ref, o_ref):
    # hidden = relu(x @ W1 + b1): x is cast to the MXU dtype in-kernel (cheap
    # VPU op hidden under the matmul); accumulate in f32; bias add / ReLU in f32.
    x = x_ref[...].astype(w1_ref.dtype)
    h = jnp.dot(x, w1_ref[...], preferred_element_type=jnp.float32)
    h = jnp.maximum(h + b1_ref[...], 0.0)
    # out = hidden @ W2 + b2
    # TODO(synk): for very large padded hidden widths (v7x 64 MiB/TC), chunk the
    # two dots over Hp with an f32 accumulator instead of materializing the
    # full TBxHp hidden + bf16 recast.
    out = jnp.dot(h.astype(w2_ref.dtype), w2_ref[...],
                  preferred_element_type=jnp.float32)
    o_ref[...] = (out + b2_ref[...]).astype(o_ref.dtype)


def prepare_params(w1, b1, w2, b2, *, dot_dtype=jnp.bfloat16, hidden_multiple=128):
    """One-time setup: cast weights to the MXU dtype and pad the hidden dim.

    w1: (F, H), b1: (H,), w2: (H, O), b2: (O,)  [weights stored (in, out), i.e.
    transposed vs. PyTorch nn.Linear .weight]. Only H is padded (lane multiple);
    F and O use full-dim blocks in the kernel, so they need no padding, no
    per-call pad/cast pass and no output slicing.
    Use dot_dtype=jnp.float32 for exact f32 parity with PyTorch (slower MXU).
    For H > 128 on v6e/v7x, hidden_multiple=256 fills the 2x256x256 MXU better.
    """
    F, H = w1.shape
    O = w2.shape[1]
    Hp = _round_up(H, hidden_multiple)
    w1p = jnp.pad(jnp.asarray(w1).astype(dot_dtype), ((0, 0), (0, Hp - H)))
    w2p = jnp.pad(jnp.asarray(w2).astype(dot_dtype), ((0, Hp - H), (0, 0)))
    b1p = jnp.pad(jnp.asarray(b1, jnp.float32).reshape(1, H), ((0, 0), (0, Hp - H)))
    b2p = jnp.asarray(b2, jnp.float32).reshape(1, O)
    return w1p, b1p, w2p, b2p


@functools.partial(jax.jit, static_argnames=("block_batch",))
def mlp_forward(x, w1p, b1p, w2p, b2p, *, block_batch=512):
    """x: (B, F) f32; params from `prepare_params`. Returns (B, O) f32.

    Note: for tiny problems (single grid step, one MXU pass) a plain fused XLA
    dot+relu+dot is at least as fast; the Pallas path pays off once the batch
    stream is long enough to overlap DMA with MXU work.
    """
    B, F = x.shape
    Fw, Hp = w1p.shape
    O = w2p.shape[1]
    assert F == Fw, (F, Fw)

    # ---- batch tiling (all static Python math under jit) ----
    b8 = _round_up(B, 8)                      # f32 sublane multiple
    TB = min(block_batch, b8)
    if b8 >= 512:
        # Keep >=2 grid steps so both v7x TensorCores get work.
        TB = min(TB, _round_up((b8 + 1) // 2, 8))
    Bp = _round_up(B, TB)

    # ---- generation-aware VMEM budget (leave ~25% headroom) ----
    wbytes = w1p.dtype.itemsize
    vmem_need = (
        2 * TB * F * 4                       # x tile, double-buffered, f32
        + 2 * TB * O * 4                     # out tile, double-buffered, f32
        + (F * Hp + Hp * O) * wbytes         # weights (single-buffered, resident)
        + (Hp + O) * 4                       # biases, f32
        + TB * F * wbytes                    # in-kernel cast of x
        + TB * Hp * 4                        # f32 hidden intermediate
        + TB * Hp * wbytes                   # recast of hidden for 2nd matmul
    )
    vmem_limit = int(min(0.75 * _vmem_capacity_bytes(),
                         max(32 * 2**20, 2 * vmem_need)))

    xp = x if Bp == B else jnp.pad(x, ((0, Bp - B), (0, 0)))

    out = pl.pallas_call(
        mlp_kernel,
        out_shape=jax.ShapeDtypeStruct((Bp, O), jnp.float32),
        grid=(Bp // TB,),
        in_specs=[
            pl.BlockSpec((TB, F), lambda i: (i, 0)),   # x: streamed per batch tile
            _resident_spec((F, Hp)),                   # W1: VMEM-resident
            _resident_spec((1, Hp)),                   # b1
            _resident_spec((Hp, O)),                   # W2
            _resident_spec((1, O)),                    # b2
        ],
        out_specs=pl.BlockSpec((TB, O), lambda i: (i, 0)),
        compiler_params=pltpu.CompilerParams(
            dimension_semantics=("parallel",),
            vmem_limit_bytes=vmem_limit,
        ),
    )(xp, w1p, b1p, w2p, b2p)

    return out if Bp == B else out[:B]


def init_params(key, input_features, num_hidden, output_features):
    """PyTorch nn.Linear default init (uniform +/- 1/sqrt(fan_in)).

    Weights are stored transposed, i.e. (in_features, out_features).
    """
    k1, k2, k3, k4 = jax.random.split(key, 4)
    bound1 = 1.0 / jnp.sqrt(input_features)
    bound2 = 1.0 / jnp.sqrt(num_hidden)
    w1 = jax.random.uniform(k1, (input_features, num_hidden), jnp.float32, -bound1, bound1)
    b1 = jax.random.uniform(k2, (num_hidden,), jnp.float32, -bound1, bound1)
    w2 = jax.random.uniform(k3, (num_hidden, output_features), jnp.float32, -bound2, bound2)
    b2 = jax.random.uniform(k4, (output_features,), jnp.float32, -bound2, bound2)
    return w1, b1, w2, b2


if __name__ == "__main__":
    batch = 8
    input_features = 32
    num_hidden = 64
    output_features = 16

    key = jax.random.PRNGKey(0)
    kx, kp = jax.random.split(key)
    x = jax.random.normal(kx, (batch, input_features), jnp.float32)
    w1, b1, w2, b2 = init_params(kp, input_features, num_hidden, output_features)

    # One-time setup (pad + cast) kept out of the per-call hot path.
    params = prepare_params(w1, b1, w2, b2)

    out = jax.block_until_ready(mlp_forward(x, *params))

    # Reference using the same numerics the kernel performs
    # (bf16 MXU operands, f32 accumulation, f32 bias add / ReLU).
    xb, w1b, w2b = (a.astype(jnp.bfloat16) for a in (x, w1, w2))
    h_ref = jnp.maximum(
        jnp.dot(xb, w1b, preferred_element_type=jnp.float32) + b1[None, :], 0.0)
    ref = jnp.dot(h_ref.astype(jnp.bfloat16), w2b,
                  preferred_element_type=jnp.float32) + b2[None, :]

    assert out.shape == (batch, output_features)
    err = float(jnp.max(jnp.abs(out - ref)))
    assert jnp.allclose(out, ref, atol=1e-2, rtol=1e-2), err

    print("KERNEL_OK")
</pallas_src>

<mosaic_0001>
module attributes {stable_mosaic.version = 11 : i64} {
  func.func @mlp_kernel(%arg0: i32, %arg1: memref<8x32xf32, #tpu.memory_space<vmem>>, %arg2: memref<32x128xbf16, #tpu.memory_space<vmem>>, %arg3: memref<1x128xf32, #tpu.memory_space<vmem>>, %arg4: memref<128x16xbf16, #tpu.memory_space<vmem>>, %arg5: memref<1x16xf32, #tpu.memory_space<vmem>>, %arg6: memref<8x16xf32, #tpu.memory_space<vmem>>) attributes {dimension_semantics = [#tpu.dimension_semantics<parallel>], iteration_bounds = array<i64: 1>, scalar_prefetch = 0 : i64, scratch_operands = 0 : i64, tpu.core_type = #tpu.core_type<tc>, window_params = [{transform_indices = @transform_0, window_bounds = array<i64: 8, 32>}, {pipeline_mode = #tpu.pipeline_mode<synchronous>, transform_indices = @transform_1, window_bounds = array<i64: 32, 128>}, {pipeline_mode = #tpu.pipeline_mode<synchronous>, transform_indices = @transform_2, window_bounds = array<i64: 1, 128>}, {pipeline_mode = #tpu.pipeline_mode<synchronous>, transform_indices = @transform_3, window_bounds = array<i64: 128, 16>}, {pipeline_mode = #tpu.pipeline_mode<synchronous>, transform_indices = @transform_4, window_bounds = array<i64: 1, 16>}, {transform_indices = @transform_5, window_bounds = array<i64: 8, 16>}]} {
    %c0 = arith.constant 0 : index
    %c0_0 = arith.constant 0 : index
    %0 = vector.load %arg1[%c0, %c0_0] : memref<8x32xf32, #tpu.memory_space<vmem>>, vector<8x32xf32>
    %1 = arith.truncf %0 : vector<8x32xf32> to vector<8x32xbf16>
    %c0_1 = arith.constant 0 : index
    %c0_2 = arith.constant 0 : index
    %2 = vector.load %arg2[%c0_1, %c0_2] : memref<32x128xbf16, #tpu.memory_space<vmem>>, vector<32x128xbf16>
    %cst = arith.constant dense<0.000000e+00> : vector<8x128xf32>
    %3 = tpu.matmul %1, %2, %cst {dimension_numbers = #tpu.dot_dimension_numbers<[1], [0], [0], [1], [0, 0, 1, 1], [], []>} : vector<8x32xbf16>, vector<32x128xbf16>, vector<8x128xf32> -> vector<8x128xf32>
    %c0_3 = arith.constant 0 : index
    %c0_4 = arith.constant 0 : index
    %4 = vector.load %arg3[%c0_3, %c0_4] : memref<1x128xf32, #tpu.memory_space<vmem>>, vector<1x128xf32>
    %5 = vector.broadcast %4 : vector<1x128xf32> to vector<8x128xf32>
    %6 = arith.addf %3, %5 : vector<8x128xf32>
    %cst_5 = arith.constant 0.000000e+00 : f32
    %7 = vector.broadcast %cst_5 : f32 to vector<8x128xf32>
    %8 = arith.maximumf %6, %7 : vector<8x128xf32>
    %9 = arith.truncf %8 : vector<8x128xf32> to vector<8x128xbf16>
    %c0_6 = arith.constant 0 : index
    %c0_7 = arith.constant 0 : index
    %10 = vector.load %arg4[%c0_6, %c0_7] : memref<128x16xbf16, #tpu.memory_space<vmem>>, vector<128x16xbf16>
    %cst_8 = arith.constant dense<0.000000e+00> : vector<8x16xf32>
    %11 = tpu.matmul %9, %10, %cst_8 {dimension_numbers = #tpu.dot_dimension_numbers<[1], [0], [0], [1], [0, 0, 1, 1], [], []>} : vector<8x128xbf16>, vector<128x16xbf16>, vector<8x16xf32> -> vector<8x16xf32>
    %c0_9 = arith.constant 0 : index
    %c0_10 = arith.constant 0 : index
    %12 = vector.load %arg5[%c0_9, %c0_10] : memref<1x16xf32, #tpu.memory_space<vmem>>, vector<1x16xf32>
    %13 = vector.broadcast %12 : vector<1x16xf32> to vector<8x16xf32>
    %14 = arith.addf %11, %13 : vector<8x16xf32>
    %c0_11 = arith.constant 0 : index
    %c0_12 = arith.constant 0 : index
    %15 = vector.load %arg6[%c0_11, %c0_12] : memref<8x16xf32, #tpu.memory_space<vmem>>, vector<8x16xf32>
    tpu.vector_store %arg6[%c0_11, %c0_12], %14 {strides = array<i32>} : memref<8x16xf32, #tpu.memory_space<vmem>>, vector<8x16xf32>,
    return
  }
  func.func @transform_0(%arg0: i32) -> (i32, i32) {
    %c0_i32 = arith.constant 0 : i32
    %c0_i32_0 = arith.constant 0 : i32
    return %arg0, %c0_i32 : i32, i32
  }
  func.func @transform_1(%arg0: i32) -> (i32, i32) {
    %c0_i32 = arith.constant 0 : i32
    %c0_i32_0 = arith.constant 0 : i32
    %c0_i32_1 = arith.constant 0 : i32
    return %c0_i32, %c0_i32_0 : i32, i32
  }
  func.func @transform_2(%arg0: i32) -> (i32, i32) {
    %c0_i32 = arith.constant 0 : i32
    %c0_i32_0 = arith.constant 0 : i32
    %c0_i32_1 = arith.constant 0 : i32
    return %c0_i32, %c0_i32_0 : i32, i32
  }
  func.func @transform_3(%arg0: i32) -> (i32, i32) {
    %c0_i32 = arith.constant 0 : i32
    %c0_i32_0 = arith.constant 0 : i32
    %c0_i32_1 = arith.constant 0 : i32
    return %c0_i32, %c0_i32_0 : i32, i32
  }
  func.func @transform_4(%arg0: i32) -> (i32, i32) {
    %c0_i32 = arith.constant 0 : i32
    %c0_i32_0 = arith.constant 0 : i32
    %c0_i32_1 = arith.constant 0 : i32
    return %c0_i32, %c0_i32_0 : i32, i32
  }
  func.func @transform_5(%arg0: i32) -> (i32, i32) {
    %c0_i32 = arith.constant 0 : i32
    %c0_i32_0 = arith.constant 0 : i32
    return %arg0, %c0_i32 : i32, i32
  }
}

</mosaic_0001>

<bundles_post_ra>
// kernel: mlp_forward.1
= control target key start
LH: loop header
LB: loop body
LE: loop exit
PB: predicated region body
PF: predicated region fallthrough
CT: control target
= control target key end

     0   :  { %v308_v1 = vmov 0.0   ;;  %vm309_vm0 = vmmov 0   ;;  %vm47_vm1 = vcmask 261120   ;;  %s383_s0 = inlined_call_operand.vmem [shape: f32[8,32], index: 0, kind: input, shape index: {}]   ;;  %s384_s1 = inlined_call_operand.vmem [shape: bf16[32,128], index: 1, kind: input, shape index: {}]   ;;  %s385_s2 = inlined_call_operand.vmem [shape: f32[1,128], index: 2, kind: input, shape index: {}]   ;;  %s386_s3 = inlined_call_operand.vmem [shape: bf16[128,16], index: 3, kind: input, shape index: {}]   ;;  %s387_s4 = inlined_call_operand.vmem [shape: f32[1,16], index: 4, kind: input, shape index: {}]   ;;  %s388_s5 = inlined_call_operand.hbm [shape: f32[8,16], index: 5, kind: output, shape index: {}]  }
   0x1   :  { %v276_v0 = vld [vmem:[%s384_s1 + $0x8] sm:$0xff]   ;;  %245 = vmatprep.subr.bf16.mxu0 %v308_v1  ;;  %v277_v2 = vld [vmem:[%s384_s1] sm:$0xff]   ;;  %253 = vmatprep.subr.bf16.mxu1 %v308_v1  ;;  %v278_v4 = vld [vmem:[%s386_s3 + $0x38] sm:$0xff]  }
   0x2   :  { %246 = vmatpush3.bf16.msra.mxu0 %v276_v0  ;;  %249 = vmatprep.mubr.msk.bf16.mxu0 %vm309_vm0, %v308_v1  ;;  %v22_v3 = vld [vmem:[%s383_s0] sm:$0xff]  ;;  %v279_v6 = vld [vmem:[%s386_s3 + $0x30] sm:$0xff]   ;;  %v280_v7 = vld [vmem:[%s386_s3 + $0x28] sm:$0xff]  }
   0x3   :  { %247 = vmatprep.subr.bf16.mxu0 %v308_v1  ;;  %269 = vmatprep.mubr.msk.bf16.mxu1 %vm309_vm0, %v308_v1  ;;  %v23_v5 = vpack.c.bf16 %v22_v3, %v22_v3 }
   0x4   :  { %254 = vmatpush3.bf16.msra.mxu1 %v278_v4 }
   0x5   :  { %255 = vmatprep.subr.bf16.mxu1 %v308_v1 }
   0x6   :  { %248 = vmatpush3.bf16.msra.mxu0 %v277_v2 }
   0x8   :  { %256 = vmatpush3.bf16.msra.mxu1 %v279_v6 }
   0x9   :  { %250 = vmatmul.mubr.msk.bf16.vlgmr.msra.gmra.mxu0 %vm47_vm1, %v23_v5  ;;  %257 = vmatprep.subr.bf16.mxu1 %v308_v1 }
   0xa   :  { %10 = vsyncpa [#allocation3], 0  ;;  %v281_v8 = vld [vmem:[%s386_s3 + $0x20] sm:$0xff]   ;;  %v282_v9 = vld [vmem:[%s386_s3 + $0x18] sm:$0xff]   ;;  %s310_s17 = smov [#allocation2]   ;;  %vm204_vm2 = vcmask 130048  }
   0xb   :  { %v283_v10 = vld [vmem:[%s386_s3 + $0x10] sm:$0xff]   ;;  %v284_v11 = vld [vmem:[%s386_s3 + $0x8] sm:$0xff]   ;;  %v285_v12 = vld [vmem:[%s386_s3] sm:$0xff]   ;;  %s212_s18 = sshll.u32 %s310_s17, 4  ;;  %s213_s18 = int_to_ptr.vmem [resolvable:$true] %s212_s18 }
   0xc   :  { %258 = vmatpush3.bf16.msra.mxu1 %v280_v7  ;;  %v220_v13 = vld [vmem:[%s385_s2] ss:$0 sm:$0xff]  ;;  %s286_s2 = scalar_lea.vmem %s213_s18, 128  ;;  %p291_p1 = scmp.lt.s32.totalorder %s213_s18, %s213_s18 }
   0xd   :  { %259 = vmatprep.subr.bf16.mxu1 %v308_v1  ;;  %v224_v21 = vld [vmem:[%s387_s4] ss:$0 sm:$0xff]  ;;  %p287_p0 = scmp.ne.s32.totalorder %s213_s18, %s286_s2  ;;  %p292_p2 = scmp.lt.s32.totalorder %s286_s2, %s286_s2 }
   0xf   :  { %p293_p3 = por %p292_p2, %p291_p1 }
  0x10   :  { %260 = vmatpush3.bf16.msra.mxu1 %v281_v8 }
  0x11   :  { %261 = vmatprep.subr.bf16.mxu1 %v308_v1  ;;  %p294_p4 = pnand %p293_p3, %p287_p0 }
  0x14   :  { %262 = vmatpush3.bf16.msra.mxu1 %v282_v9 }
  0x15   :  { %263 = vmatprep.subr.bf16.mxu1 %v308_v1 }
  0x18   :  { %264 = vmatpush3.bf16.msra.mxu1 %v283_v10 }
  0x19   :  { %265 = vmatprep.subr.bf16.mxu1 %v308_v1 }
  0x1c   :  { %266 = vmatpush3.bf16.msra.mxu1 %v284_v11 }
  0x1d   :  { %267 = vmatprep.subr.bf16.mxu1 %v308_v1 }
  0x20   :  { %268 = vmatpush3.bf16.msra.mxu1 %v285_v12 }
  0xc9   :  { %v85_v14 = vpop.f32.mrf.mxu0 }
  0xca   :  { %v86_v15 = vadd.f32 %v220_v13, %v85_v14 }
  0xcb   :  { %v251_v16 = vpop.f32.mrf.mxu0 }
  0xcc   :  { %v91_v17 = vmax.f32 %v86_v15, 0.0 }
  0xcd   :  { %v88_v18 = vpop.f32.mrf.mxu0 }
  0xce   :  { %v92_v19 = vpack.c.bf16 %v91_v17, %v91_v17 }
  0xcf   :  { %v252_v20 = vpop.f32.mrf.mxu0 }
  0xd0   :  { %270 = vmatmul.mubr.bf16.vlgmr.msra.gmra.mxu1 %v92_v19 }
 0x190   :  { %v198_v22 = vpop.f32.mrf.mxu1 }
 0x191   :  { %v199_v23 = vadd.f32 %v224_v21, %v198_v22 }
 0x192   :  { %v271_v24 = vpop.f32.mrf.mxu1 }
 0x193   :  { %205 = vst.msk [vmem:[#allocation2] sm:$0xff] %vm204_vm2, %v199_v23 }
 0x194   :  { %v201_v25 = vpop.f32.mrf.mxu1 }
 0x195   :  { %297 = shalt.err (!%p294_p4)
}
 0x196   :  { %215 = dma.vmem_to_hbm [thread:$0]  %s213_s18, 128, %s388_s5, [#allocation3]   ;;  %v272_v26 = vpop.f32.mrf.mxu1 }
 0x197   :  { %306 = dma.done.wait [#allocation3], 128  }
 0x198   :  { %307 = vsyncadd [#allocation3], 4294967168 }
 0x199   :  { %219 = vsyncpa [#allocation3], 1 }

</bundles_post_ra>
